<compile_context>
chip_gen: v5e
topology: v5e:2x2
jax: 0.10.0
libtpu: 0.0.40
codegen_flags: <defaults>
</compile_context>

<pallas_src>
import functools

import jax
import jax.numpy as jnp
from jax.experimental import pallas as pl
from jax.experimental.pallas import tpu as pltpu


def _round_up(x, m):
    return ((x + m - 1) // m) * m


def policy_kernel(x_ref, w1_ref, b1_ref, w2_ref, b2_ref, o_ref):
    # x_ref:  (TB, obs_dim)        tile of the batch (f32 or bf16)
    # w1_ref: (obs_dim, hidden)    resident           (f32 or bf16)
    # b1_ref: (1, hidden)          resident, f32
    # w2_ref: (hidden, n_pad)      resident, lane-padded (f32 or bf16)
    # b2_ref: (1, n_pad)           resident, f32, padded lanes = -1e30
    # o_ref:  (TB, n_pad)          f32 softmax probabilities (padded lanes exactly 0)
    x = x_ref[...]

    # First linear + tanh (f32 MXU accumulate; tanh on the EUP in f32).
    h = jnp.dot(x, w1_ref[...], preferred_element_type=jnp.float32) + b1_ref[...]
    h = jnp.tanh(h)

    # Second linear: feed operands in the weight dtype so bf16 hits the MXU natively.
    h = h.astype(w2_ref.dtype)
    logits = jnp.dot(h, w2_ref[...], preferred_element_type=jnp.float32) + b2_ref[...]

    # Softmax over the lane-padded last axis.  Padded columns carry bias -1e30 so their
    # exp underflows to exactly 0 and they contribute nothing to the denominator.
    m = jnp.max(logits, axis=-1, keepdims=True)
    e = jnp.exp(logits - m)
    s = jnp.sum(e, axis=-1, keepdims=True)
    o_ref[...] = (e / s).astype(o_ref.dtype)


@functools.partial(jax.jit, static_argnames=("batch_tile", "use_bf16"))
def policy_over_options(x, w1, b1, w2, b2, *, batch_tile=1024, use_bf16=False):
    """Forward pass of PolicyOverOptions. Returns (B, n_options) softmax probabilities."""
    B, obs_dim = x.shape
    hidden = w1.shape[1]
    n_options = w2.shape[1]

    LANE = 128
    n_pad = _round_up(max(n_options, LANE), LANE)

    # Lane-pad the second layer: zero weights, -1e30 bias on padded columns.
    w2p = jnp.zeros((hidden, n_pad), dtype=w2.dtype).at[:, :n_options].set(w2)
    b2p = jnp.full((1, n_pad), -1e30, dtype=jnp.float32).at[:, :n_options].set(
        b2.reshape(1, n_options).astype(jnp.float32))
    b1f = b1.reshape(1, hidden).astype(jnp.float32)

    # Batch tile: as large as possible (amortizes per-step overhead), multiple of 8,
    # never larger than the 8-aligned batch.  Pad B up so the grid divides evenly.
    bt = min(_round_up(batch_tile, 8), _round_up(B, 8))
    B_pad = _round_up(B, bt)
    if B_pad != B:
        x = jnp.pad(x, ((0, B_pad - B), (0, 0)))

    if use_bf16:
        # x dominates HBM read traffic; bf16 halves it and keeps the MXU in native mode.
        x = x.astype(jnp.bfloat16)
        w1 = w1.astype(jnp.bfloat16)
        w2p = w2p.astype(jnp.bfloat16)

    grid = (B_pad // bt,)

    flops = 2 * B_pad * (obs_dim * hidden + hidden * n_pad)
    transcendentals = B_pad * (hidden + n_pad)  # tanh + exp
    bytes_accessed = (
        x.size * x.dtype.itemsize
        + w1.size * w1.dtype.itemsize
        + b1f.size * 4
        + w2p.size * w2p.dtype.itemsize
        + b2p.size * 4
        + B_pad * n_pad * 4
    )

    out = pl.pallas_call(
        policy_kernel,
        out_shape=jax.ShapeDtypeStruct((B_pad, n_pad), jnp.float32),
        grid_spec=pltpu.PrefetchScalarGridSpec(
            num_scalar_prefetch=0,
            grid=grid,
            in_specs=[
                pl.BlockSpec((bt, obs_dim), lambda i: (i, 0)),       # x: tiled over batch
                pl.BlockSpec((obs_dim, hidden), lambda i: (0, 0)),   # w1: resident
                pl.BlockSpec((1, hidden), lambda i: (0, 0)),         # b1: resident
                pl.BlockSpec((hidden, n_pad), lambda i: (0, 0)),     # w2 (lane-padded)
                pl.BlockSpec((1, n_pad), lambda i: (0, 0)),          # b2 (lane-padded)
            ],
            out_specs=pl.BlockSpec((bt, n_pad), lambda i: (i, 0)),
        ),
        compiler_params=pltpu.CompilerParams(
            dimension_semantics=("parallel",),
        ),
        cost_estimate=pl.CostEstimate(
            flops=flops,
            transcendentals=transcendentals,
            bytes_accessed=bytes_accessed,
        ),
    )(x, w1, b1f, w2p, b2p)

    return out[:B, :n_options]


def _make_params(key, observation_dim, hidden_dim, n_options):
    kw1, kb1, kw2, kb2 = jax.random.split(key, 4)
    # PyTorch Linear default init: U(-1/sqrt(fan_in), 1/sqrt(fan_in)).
    lim1 = 1.0 / jnp.sqrt(observation_dim)
    lim2 = 1.0 / jnp.sqrt(hidden_dim)
    w1 = jax.random.uniform(kw1, (observation_dim, hidden_dim), jnp.float32, -lim1, lim1)
    b1 = jax.random.uniform(kb1, (1, hidden_dim), jnp.float32, -lim1, lim1)
    w2 = jax.random.uniform(kw2, (hidden_dim, n_options), jnp.float32, -lim2, lim2)
    b2 = jax.random.uniform(kb2, (1, n_options), jnp.float32, -lim2, lim2)
    return w1, b1, w2, b2


def _reference(x, w1, b1, w2, b2):
    # nn.Sequential(Linear, Tanh, Linear, Softmax(dim=-1))
    return jax.nn.softmax(jnp.tanh(x @ w1 + b1) @ w2 + b2, axis=-1)


if __name__ == "__main__":
    observation_dim = 16
    hidden_dim = 32
    n_options = 4

    key = jax.random.PRNGKey(0)
    kx1, kx2, kp = jax.random.split(key, 3)
    w1, b1, w2, b2 = _make_params(kp, observation_dim, hidden_dim, n_options)

    # --- Test 1: f32 path, ragged batch (exercises pad-and-slice), tight tolerance. ---
    batch = 10
    x = jax.random.normal(kx1, (batch, observation_dim), dtype=jnp.float32)
    out = jax.block_until_ready(policy_over_options(x, w1, b1, w2, b2))
    ref = _reference(x, w1, b1, w2, b2)
    assert out.shape == (batch, n_options)
    assert jnp.allclose(out, ref, atol=1e-5, rtol=1e-5), "f32 mismatch vs reference"
    # Rows are probability distributions.
    assert jnp.allclose(out.sum(-1), 1.0, atol=1e-5), "softmax rows do not sum to 1"

    # --- Test 2: bf16 operand path (v6e/v7x fast path), multi-step grid, loose tol. ---
    batch2 = 48
    x2 = jax.random.normal(kx2, (batch2, observation_dim), dtype=jnp.float32)
    out2 = jax.block_until_ready(
        policy_over_options(x2, w1, b1, w2, b2, batch_tile=16, use_bf16=True))
    ref2 = _reference(x2, w1, b1, w2, b2)
    assert out2.shape == (batch2, n_options)
    assert jnp.allclose(out2, ref2, atol=2e-2, rtol=2e-2), "bf16 mismatch vs reference"
    assert jnp.allclose(out2.sum(-1), 1.0, atol=1e-3), "bf16 softmax rows do not sum to 1"

    print("KERNEL_OK")
</pallas_src>

<mosaic_0001>
module attributes {stable_mosaic.version = 11 : i64} {
  func.func @policy_kernel(%arg0: i32, %arg1: memref<16x16xf32, #tpu.memory_space<vmem>>, %arg2: memref<16x32xf32, #tpu.memory_space<vmem>>, %arg3: memref<1x32xf32, #tpu.memory_space<vmem>>, %arg4: memref<32x128xf32, #tpu.memory_space<vmem>>, %arg5: memref<1x128xf32, #tpu.memory_space<vmem>>, %arg6: memref<16x128xf32, #tpu.memory_space<vmem>>) attributes {dimension_semantics = [#tpu.dimension_semantics<parallel>], iteration_bounds = array<i64: 1>, scalar_prefetch = 0 : i64, scratch_operands = 0 : i64, tpu.core_type = #tpu.core_type<tc>, window_params = [{transform_indices = @transform_0, window_bounds = array<i64: 16, 16>}, {pipeline_mode = #tpu.pipeline_mode<synchronous>, transform_indices = @transform_1, window_bounds = array<i64: 16, 32>}, {pipeline_mode = #tpu.pipeline_mode<synchronous>, transform_indices = @transform_2, window_bounds = array<i64: 1, 32>}, {pipeline_mode = #tpu.pipeline_mode<synchronous>, transform_indices = @transform_3, window_bounds = array<i64: 32, 128>}, {pipeline_mode = #tpu.pipeline_mode<synchronous>, transform_indices = @transform_4, window_bounds = array<i64: 1, 128>}, {transform_indices = @transform_5, window_bounds = array<i64: 16, 128>}]} {
    %c0 = arith.constant 0 : index
    %c0_0 = arith.constant 0 : index
    %0 = vector.load %arg1[%c0, %c0_0] : memref<16x16xf32, #tpu.memory_space<vmem>>, vector<16x16xf32>
    %c0_1 = arith.constant 0 : index
    %c0_2 = arith.constant 0 : index
    %1 = vector.load %arg2[%c0_1, %c0_2] : memref<16x32xf32, #tpu.memory_space<vmem>>, vector<16x32xf32>
    %cst = arith.constant dense<0.000000e+00> : vector<16x32xf32>
    %2 = tpu.matmul %0, %1, %cst {dimension_numbers = #tpu.dot_dimension_numbers<[1], [0], [0], [1], [0, 0, 1, 1], [], []>} : vector<16x16xf32>, vector<16x32xf32>, vector<16x32xf32> -> vector<16x32xf32>
    %c0_3 = arith.constant 0 : index
    %c0_4 = arith.constant 0 : index
    %3 = vector.load %arg3[%c0_3, %c0_4] : memref<1x32xf32, #tpu.memory_space<vmem>>, vector<1x32xf32>
    %4 = vector.broadcast %3 : vector<1x32xf32> to vector<16x32xf32>
    %5 = arith.addf %2, %4 : vector<16x32xf32>
    %6 = math.tanh %5 : vector<16x32xf32>
    %c0_5 = arith.constant 0 : index
    %c0_6 = arith.constant 0 : index
    %7 = vector.load %arg4[%c0_5, %c0_6] : memref<32x128xf32, #tpu.memory_space<vmem>>, vector<32x128xf32>
    %cst_7 = arith.constant dense<0.000000e+00> : vector<16x128xf32>
    %8 = tpu.matmul %6, %7, %cst_7 {dimension_numbers = #tpu.dot_dimension_numbers<[1], [0], [0], [1], [0, 0, 1, 1], [], []>} : vector<16x32xf32>, vector<32x128xf32>, vector<16x128xf32> -> vector<16x128xf32>
    %c0_8 = arith.constant 0 : index
    %c0_9 = arith.constant 0 : index
    %9 = vector.load %arg5[%c0_8, %c0_9] : memref<1x128xf32, #tpu.memory_space<vmem>>, vector<1x128xf32>
    %10 = vector.broadcast %9 : vector<1x128xf32> to vector<16x128xf32>
    %11 = arith.addf %8, %10 : vector<16x128xf32>
    %cst_10 = arith.constant dense<0xFF800000> : vector<16xf32>
    %12 = vector.multi_reduction <maximumf>, %11, %cst_10 [1] : vector<16x128xf32> to vector<16xf32>
    %13 = vector.shape_cast %12 : vector<16xf32> to vector<16x1xf32>
    %14 = vector.broadcast %13 : vector<16x1xf32> to vector<16x128xf32>
    %15 = arith.subf %11, %14 : vector<16x128xf32>
    %16 = math.exp %15 : vector<16x128xf32>
    %cst_11 = arith.constant dense<0.000000e+00> : vector<16xf32>
    %17 = vector.multi_reduction <add>, %16, %cst_11 [1] : vector<16x128xf32> to vector<16xf32>
    %18 = vector.shape_cast %17 : vector<16xf32> to vector<16x1xf32>
    %19 = vector.broadcast %18 : vector<16x1xf32> to vector<16x128xf32>
    %20 = arith.divf %16, %19 : vector<16x128xf32>
    %c0_12 = arith.constant 0 : index
    %c0_13 = arith.constant 0 : index
    %21 = vector.load %arg6[%c0_12, %c0_13] : memref<16x128xf32, #tpu.memory_space<vmem>>, vector<16x128xf32>
    tpu.vector_store %arg6[%c0_12, %c0_13], %20 {strides = array<i32>} : memref<16x128xf32, #tpu.memory_space<vmem>>, vector<16x128xf32>,
    return
  }
  func.func @transform_0(%arg0: i32) -> (i32, i32) {
    %c0_i32 = arith.constant 0 : i32
    %c0_i32_0 = arith.constant 0 : i32
    return %arg0, %c0_i32 : i32, i32
  }
  func.func @transform_1(%arg0: i32) -> (i32, i32) {
    %c0_i32 = arith.constant 0 : i32
    %c0_i32_0 = arith.constant 0 : i32
    %c0_i32_1 = arith.constant 0 : i32
    return %c0_i32, %c0_i32_0 : i32, i32
  }
  func.func @transform_2(%arg0: i32) -> (i32, i32) {
    %c0_i32 = arith.constant 0 : i32
    %c0_i32_0 = arith.constant 0 : i32
    %c0_i32_1 = arith.constant 0 : i32
    return %c0_i32, %c0_i32_0 : i32, i32
  }
  func.func @transform_3(%arg0: i32) -> (i32, i32) {
    %c0_i32 = arith.constant 0 : i32
    %c0_i32_0 = arith.constant 0 : i32
    %c0_i32_1 = arith.constant 0 : i32
    return %c0_i32, %c0_i32_0 : i32, i32
  }
  func.func @transform_4(%arg0: i32) -> (i32, i32) {
    %c0_i32 = arith.constant 0 : i32
    %c0_i32_0 = arith.constant 0 : i32
    %c0_i32_1 = arith.constant 0 : i32
    return %c0_i32, %c0_i32_0 : i32, i32
  }
  func.func @transform_5(%arg0: i32) -> (i32, i32) {
    %c0_i32 = arith.constant 0 : i32
    %c0_i32_0 = arith.constant 0 : i32
    return %arg0, %c0_i32 : i32, i32
  }
}

</mosaic_0001>

<bundles_post_ra>
// kernel: policy_over_options.1
= control target key start
LH: loop header
LB: loop body
LE: loop exit
PB: predicated region body
PF: predicated region fallthrough
CT: control target
= control target key end

     0   :  { %vm28_vm0 = vcmask 130048   ;;  %vm68_vm1 = vcmask 261120   ;;  %s238_s1 = inlined_call_operand.vmem [shape: f32[16,32], index: 1, kind: input, shape index: {}]   ;;  %s239_s0 = inlined_call_operand.vmem [shape: f32[16,16], index: 0, kind: input, shape index: {}]   ;;  %s240_s2 = inlined_call_operand.vmem [shape: f32[1,32], index: 2, kind: input, shape index: {}]   ;;  %s241_s4 = inlined_call_operand.vmem [shape: f32[1,128], index: 4, kind: input, shape index: {}]   ;;  %s242_s3 = inlined_call_operand.vmem [shape: f32[32,128], index: 3, kind: input, shape index: {}]   ;;  %s243_s5 = inlined_call_operand.vmem [shape: f32[16,128], index: 5, kind: output, shape index: {}]  }
   0x1   :  { %v23_v0 = vld [vmem:[%s238_s1 + $0x8] sm:$0xff]  ;;  %v22_v1 = vld [vmem:[%s238_s1] sm:$0xff]  ;;  %v63_v4 = vld [vmem:[%s242_s3 + $0x18] sm:$0xff] }
   0x2   :  { %49 = vmatpush.msra.mxu0 %v23_v0  ;;  %152 = vmatpush.msra.mxu3 %v23_v0  ;;  %v20_v2 = vld [vmem:[%s239_s0] sm:$0xff]  ;;  %v21_v3 = vld [vmem:[%s239_s0 + $0x8] sm:$0xff]  ;;  %v62_v5 = vld [vmem:[%s242_s3 + $0x10] sm:$0xff] }
   0x3   :  { %87 = vmatpush.msra.mxu1 %v63_v4  ;;  %154 = vmatpush.msra.mxu2 %v63_v4  ;;  %v61_v6 = vld [vmem:[%s242_s3 + $0x8] sm:$0xff]  ;;  %v60_v7 = vld [vmem:[%s242_s3] sm:$0xff] }
   0x4   :  { %50 = vmatpush.msra.mxu0 %v22_v1  ;;  %153 = vmatpush.msra.mxu3 %v22_v1  ;;  %v158_v8 = vld [vmem:[%s240_s2] ss:$0 sm:$0xff] }
   0x5   :  { %148 = vmatmul.msk.f32.vlgmr.msra.gmra.mxu0 %vm28_vm0, %v20_v2  ;;  %149 = vmatmul.msk.f32.vlgmr.msra.gmra.mxu3 %vm28_vm0, %v21_v3  ;;  %v159_v15 = vld [vmem:[%s241_s4] ss:$0 sm:$0xff] }
   0x6   :  { %88 = vmatpush.msra.mxu1 %v62_v5  ;;  %155 = vmatpush.msra.mxu2 %v62_v5 }
   0x8   :  { %89 = vmatpush.msra.mxu1 %v61_v6  ;;  %156 = vmatpush.msra.mxu2 %v61_v6 }
   0xa   :  { %90 = vmatpush.msra.mxu1 %v60_v7  ;;  %157 = vmatpush.msra.mxu2 %v60_v7 }
  0x82   :  { %v52_v9 = vpop.f32.mrf.mxu0 }
  0x83   :  { %v53_v10 = vadd.f32 %v158_v8, %v52_v9 }
  0x85   :  { %160 = vtanh.f32 %v53_v10 }
  0x88   :  { %v55_v11 = vpop.f32.mrf.mxu3 }
  0x89   :  { %v56_v12 = vadd.f32 %v158_v8, %v55_v11 }
  0x8b   :  { %v161_v13 = vpop.eup %160  ;;  %162 = vtanh.f32 %v56_v12 }
  0x8c   :  { %150 = vmatmul.msk.f32.vlgmr.msra.gmra.mxu1 %vm68_vm1, %v161_v13 }
  0x91   :  { %v163_v14 = vpop.eup %162 }
  0x92   :  { %151 = vmatmul.msk.f32.vlgmr.msra.gmra.mxu2 %vm68_vm1, %v163_v14 }
 0x109   :  { %v92_v16 = vpop.f32.mrf.mxu1 }
 0x10a   :  { %v93_v17 = vadd.f32 %v159_v15, %v92_v16 }
 0x10c   :  { %98 = vmax.xlane.f32.xlu0 %v93_v17 }
 0x115   :  { %v95_v18 = vpop.f32.mrf.mxu2 }
 0x116   :  { %v96_v19 = vadd.f32 %v159_v15, %v95_v18 }
 0x118   :  { %100 = vmax.xlane.f32.xlu0 %v96_v19 }
 0x17f   :  { %v99_v20 = vpop.xlane.xlu0 %98 }
 0x180   :  { %v102_v21 = vsub.f32 %v93_v17, %v99_v20 }
 0x182   :  { %v104_v22 = vmul.f32 1.442695, %v102_v21 }
 0x184   :  { %164 = vpow2.f32 %v104_v22 }
 0x18a   :  { %v165_v23 = vpop.eup %164 }
 0x18b   :  { %108 = vadd.xlane.f32.xlu1 %v165_v23  ;;  %v101_v24 = vpop.xlane.xlu0 %100 }
 0x18c   :  { %v103_v25 = vsub.f32 %v96_v19, %v101_v24 }
 0x18e   :  { %v106_v26 = vmul.f32 1.442695, %v103_v25 }
 0x190   :  { %166 = vpow2.f32 %v106_v26 }
 0x196   :  { %v167_v27 = vpop.eup %166 }
 0x197   :  { %110 = vadd.xlane.f32.xlu1 %v167_v27 }
 0x1fe   :  { %v109_v28 = vpop.xlane.xlu1 %108 }
 0x1ff   :  { %168 = vrcp.f32 %v109_v28  ;;  %v123_v32 = vand.u32 2147483648, %v109_v28  ;;  %v121_v34 = vand.u32 2147483647, %v109_v28  ;;  %vm117_vm3 = vweird.f32 %v109_v28 }
 0x201   :  { %v124_v37 = vor.u32 1.1754944e-38, %v123_v32  ;;  %vm122_vm5 = vcmp.eq.f32.partialorder %v121_v34, 8.507059e+37 }
 0x205   :  { %v169_v29 = vpop.eup %168 }
 0x206   :  { %v113_v30 = vmul.f32 %v169_v29, %v109_v28  ;;  %vm118_vm2 = vweird.f32 %v169_v29 }
 0x207   :  { %vm119_vm4 = vmor %vm117_vm3, %vm118_vm2 }
 0x208   :  { %v114_v31 = vsub.f32 1.0, %v113_v30 }
 0x20a   :  { %v115_v33 = vmul.f32 %v169_v29, %v114_v31  ;;  %v111_v35 = vpop.xlane.xlu1 %110 }
 0x20b   :  { %170 = vrcp.f32 %v111_v35  ;;  %v138_v44 = vand.u32 2147483648, %v111_v35  ;;  %v136_v46 = vand.u32 2147483647, %v111_v35  ;;  %vm132_vm7 = vweird.f32 %v111_v35 }
 0x20c   :  { %v116_v36 = vadd.f32 %v169_v29, %v115_v33 }
 0x20d   :  { %v139_v48 = vor.u32 1.1754944e-38, %v138_v44  ;;  %vm137_vm9 = vcmp.eq.f32.partialorder %v136_v46, 8.507059e+37 }
 0x20e   :  { %v120_v38 = vsel %vm119_vm4, %v169_v29, %v116_v36 }
 0x20f   :  { %v125_v39 = vsel %vm122_vm5, %v124_v37, %v120_v38 }
 0x210   :  { %v126_v40 = vmul.f32 %v165_v23, %v125_v39 }
 0x211   :  { %v171_v41 = vpop.eup %170 }
 0x212   :  { %142 = vst [vmem:[%s243_s5] sm:$0xff] %v126_v40  ;;  %v128_v42 = vmul.f32 %v171_v41, %v111_v35  ;;  %vm133_vm6 = vweird.f32 %v171_v41 }
 0x213   :  { %vm134_vm8 = vmor %vm132_vm7, %vm133_vm6 }
 0x214   :  { %v129_v43 = vsub.f32 1.0, %v128_v42 }
 0x216   :  { %v130_v45 = vmul.f32 %v171_v41, %v129_v43 }
 0x218   :  { %v131_v47 = vadd.f32 %v171_v41, %v130_v45 }
 0x21a   :  { %v135_v49 = vsel %vm134_vm8, %v171_v41, %v131_v47 }
 0x21b   :  { %v140_v50 = vsel %vm137_vm9, %v139_v48, %v135_v49 }
 0x21c   :  { %v141_v51 = vmul.f32 %v167_v27, %v140_v50 }
 0x21e   :  { %143 = vst [vmem:[%s243_s5 + $0x8] sm:$0xff] %v141_v51 }

</bundles_post_ra>
